<compile_context>
chip_gen: v7x
topology: tpu7x:2x2x1
jax: 0.10.0
libtpu: 0.0.40
codegen_flags: <defaults>
</compile_context>

<pallas_src>
import functools

import jax
import jax.numpy as jnp
from jax.experimental import pallas as pl
from jax.experimental.pallas import tpu as pltpu


def _round_up(x, m):
    return ((x + m - 1) // m) * m


def _decoder_kernel(z_ref, w1_ref, b1_ref, w2_ref, b2_ref, w3_ref, b3_ref,
                    o_ref):
    # z tile: [TILE_B, in_dim]; weights/biases resident in VMEM across steps.
    z = z_ref[...]
    # layer 1: Linear (MXU, f32 accumulate) + bias + ReLU (VPU, f32)
    h1 = jnp.dot(z, w1_ref[...], preferred_element_type=jnp.float32)
    h1 = jnp.maximum(h1 + b1_ref[...], 0.0)                    # [TILE_B, h1]
    # layer 2
    h2 = jnp.dot(h1.astype(w2_ref.dtype), w2_ref[...],
                 preferred_element_type=jnp.float32)
    h2 = jnp.maximum(h2 + b2_ref[...], 0.0)                    # [TILE_B, h2]
    # layer 3 (no activation) — natural out_dim-wide block (full-dim)
    out = jnp.dot(h2.astype(w3_ref.dtype), w3_ref[...],
                  preferred_element_type=jnp.float32)
    o_ref[...] = (out + b3_ref[...]).astype(o_ref.dtype)       # [TILE_B, out_dim]


@functools.partial(jax.jit,
                   static_argnames=("tile_b", "out_dtype", "core_parallel"))
def decoder_forward(z, w1, b1, w2, b2, w3, b3, *, tile_b=1024, out_dtype=None,
                    core_parallel=False):
    """Fused 3-layer MLP decoder.

    z:  [B, in_dim] (f32 or bf16 — caller decides; no in-wrapper cast)
    w*: [fan_in, fan_out], b*: [1, fan_out] (biases ideally f32)
    Returns [B, out_dim] in `out_dtype` (default f32).
    """
    B, in_dim = z.shape
    h_dim1 = w1.shape[1]
    h_dim2 = w2.shape[1]
    out_dim = w3.shape[1]
    out_dtype = jnp.dtype(out_dtype) if out_dtype is not None else jnp.dtype(jnp.float32)

    # ---- batch tiling: big row tile; multiple of 8 (f32) / 16 (bf16 packing) -
    sub = 16 if jnp.dtype(z.dtype).itemsize == 2 else 8
    tile_b = _round_up(max(int(tile_b), sub), sub)
    tile_b = min(tile_b, _round_up(B, sub))
    grid = (pl.cdiv(B, tile_b),)   # ragged last block handled by Pallas masking

    def resident(arr):
        # Whole-array block; constant index_map -> stays in VMEM across steps
        # (no re-DMA of the weights per batch tile).
        n = arr.ndim
        return pl.BlockSpec(arr.shape, lambda i, _n=n: (0,) * _n)

    itemsize = lambda a: a.size * a.dtype.itemsize
    flops = 2 * B * (in_dim * h_dim1 + h_dim1 * h_dim2 + h_dim2 * out_dim)
    bytes_accessed = (itemsize(z)
                      + sum(itemsize(a) for a in (w1, b1, w2, b2, w3, b3))
                      + B * out_dim * out_dtype.itemsize)

    # "parallel" is safe everywhere; CORE_PARALLEL is the knob that actually
    # changes codegen for v7x's dual TensorCores (expect modest gains: HBM-bound).
    sems = (pltpu.CORE_PARALLEL,) if core_parallel else ("parallel",)

    out = pl.pallas_call(
        _decoder_kernel,
        out_shape=jax.ShapeDtypeStruct((B, out_dim), out_dtype),
        grid_spec=pl.GridSpec(
            grid=grid,
            in_specs=[
                pl.BlockSpec((tile_b, in_dim), lambda i: (i, 0)),   # z tile
                resident(w1), resident(b1),
                resident(w2), resident(b2),
                resident(w3), resident(b3),
            ],
            out_specs=pl.BlockSpec((tile_b, out_dim), lambda i: (i, 0)),
        ),
        compiler_params=pltpu.CompilerParams(
            dimension_semantics=sems,
            # ~3-5 MiB actually needed at tile_b=1024 (lane-padded, double
            # buffered); 32 MiB keeps headroom under v7x's 64 MiB physical VMEM.
            vmem_limit_bytes=32 << 20,
        ),
        cost_estimate=pl.CostEstimate(
            flops=flops, transcendentals=0, bytes_accessed=bytes_accessed),
    )(z, w1, b1, w2, b2, w3, b3)

    return out


def _init_linear_params(key, fan_in, fan_out):
    """Deterministic init mimicking torch.nn.Linear's uniform(-1/sqrt(fan_in))."""
    kw, kb = jax.random.split(key)
    bound = 1.0 / jnp.sqrt(jnp.float32(fan_in))
    # stored as [fan_in, fan_out] (transposed vs. PyTorch) for y = x @ W + b
    w = jax.random.uniform(kw, (fan_in, fan_out), jnp.float32, -bound, bound)
    b = jax.random.uniform(kb, (1, fan_out), jnp.float32, -bound, bound)
    return w, b


def _reference(z, w1, b1, w2, b2, w3, b3):
    h = jnp.maximum(z @ w1 + b1, 0.0)
    h = jnp.maximum(h @ w2 + b2, 0.0)
    return h @ w3 + b3


if __name__ == "__main__":
    # Small shapes consistent with the module's forward:
    # in_dim (latent) = 16, h_dim1 = 32, h_dim2 = 32, out_dim = 64
    in_dim, h_dim1, h_dim2, out_dim = 16, 32, 32, 64

    key = jax.random.PRNGKey(0)
    kz, kz2, k1, k2, k3 = jax.random.split(key, 5)

    w1, b1 = _init_linear_params(k1, in_dim, h_dim1)
    w2, b2 = _init_linear_params(k2, h_dim1, h_dim2)
    w3, b3 = _init_linear_params(k3, h_dim2, out_dim)

    # --- small batch (spec-sized), f32 path, default tile ---------------------
    B = 8
    z = jax.random.normal(kz, (B, in_dim), jnp.float32)
    out = decoder_forward(z, w1, b1, w2, b2, w3, b3)
    out = jax.block_until_ready(out)
    ref = _reference(z, w1, b1, w2, b2, w3, b3)
    assert out.shape == (B, out_dim)
    assert jnp.allclose(out, ref, atol=1e-5, rtol=1e-5)

    # --- larger, non-multiple batch: multi-step grid + ragged last block ------
    B2 = 300
    z2 = jax.random.normal(kz2, (B2, in_dim), jnp.float32)
    ref2 = _reference(z2, w1, b1, w2, b2, w3, b3)

    out2 = decoder_forward(z2, w1, b1, w2, b2, w3, b3, tile_b=128)
    out2 = jax.block_until_ready(out2)
    assert out2.shape == (B2, out_dim)
    assert jnp.allclose(out2, ref2, atol=1e-5, rtol=1e-5)

    # default (large) tile: single ragged block covering the whole batch
    out2b = decoder_forward(z2, w1, b1, w2, b2, w3, b3)
    out2b = jax.block_until_ready(out2b)
    assert jnp.allclose(out2b, ref2, atol=1e-5, rtol=1e-5)

    # --- bf16 activations/weights from the caller, bf16 output ----------------
    # (caller-side cast simulates a bf16 producer; biases stay f32 so the
    #  VPU-side bias/ReLU math remains f32 — note activations are double-rounded
    #  to bf16 between layers vs. the f32 reference)
    z2_bf = z2.astype(jnp.bfloat16)
    w1_bf, w2_bf, w3_bf = (w.astype(jnp.bfloat16) for w in (w1, w2, w3))
    out3 = decoder_forward(z2_bf, w1_bf, b1, w2_bf, b2, w3_bf, b3,
                           tile_b=128, out_dtype=jnp.bfloat16)
    out3 = jax.block_until_ready(out3)
    assert out3.dtype == jnp.bfloat16
    assert jnp.allclose(out3.astype(jnp.float32), ref2, atol=1e-1, rtol=1e-1)

    print("KERNEL_OK")
</pallas_src>

<mosaic_0001>
module attributes {stable_mosaic.version = 11 : i64} {
  func.func @_decoder_kernel(%arg0: i32, %arg1: memref<8x16xf32, #tpu.memory_space<vmem>>, %arg2: memref<16x32xf32, #tpu.memory_space<vmem>>, %arg3: memref<1x32xf32, #tpu.memory_space<vmem>>, %arg4: memref<32x32xf32, #tpu.memory_space<vmem>>, %arg5: memref<1x32xf32, #tpu.memory_space<vmem>>, %arg6: memref<32x64xf32, #tpu.memory_space<vmem>>, %arg7: memref<1x64xf32, #tpu.memory_space<vmem>>, %arg8: memref<8x64xf32, #tpu.memory_space<vmem>>) attributes {dimension_semantics = [#tpu.dimension_semantics<parallel>], iteration_bounds = array<i64: 1>, scalar_prefetch = 0 : i64, scratch_operands = 0 : i64, tpu.core_type = #tpu.core_type<tc>, window_params = [{transform_indices = @transform_0, window_bounds = array<i64: 8, 16>}, {pipeline_mode = #tpu.pipeline_mode<synchronous>, transform_indices = @transform_1, window_bounds = array<i64: 16, 32>}, {pipeline_mode = #tpu.pipeline_mode<synchronous>, transform_indices = @transform_2, window_bounds = array<i64: 1, 32>}, {pipeline_mode = #tpu.pipeline_mode<synchronous>, transform_indices = @transform_3, window_bounds = array<i64: 32, 32>}, {pipeline_mode = #tpu.pipeline_mode<synchronous>, transform_indices = @transform_4, window_bounds = array<i64: 1, 32>}, {pipeline_mode = #tpu.pipeline_mode<synchronous>, transform_indices = @transform_5, window_bounds = array<i64: 32, 64>}, {pipeline_mode = #tpu.pipeline_mode<synchronous>, transform_indices = @transform_6, window_bounds = array<i64: 1, 64>}, {transform_indices = @transform_7, window_bounds = array<i64: 8, 64>}]} {
    %c0 = arith.constant 0 : index
    %c0_0 = arith.constant 0 : index
    %0 = vector.load %arg1[%c0, %c0_0] : memref<8x16xf32, #tpu.memory_space<vmem>>, vector<8x16xf32>
    %c0_1 = arith.constant 0 : index
    %c0_2 = arith.constant 0 : index
    %1 = vector.load %arg2[%c0_1, %c0_2] : memref<16x32xf32, #tpu.memory_space<vmem>>, vector<16x32xf32>
    %cst = arith.constant dense<0.000000e+00> : vector<8x32xf32>
    %2 = tpu.matmul %0, %1, %cst {dimension_numbers = #tpu.dot_dimension_numbers<[1], [0], [0], [1], [0, 0, 1, 1], [], []>} : vector<8x16xf32>, vector<16x32xf32>, vector<8x32xf32> -> vector<8x32xf32>
    %c0_3 = arith.constant 0 : index
    %c0_4 = arith.constant 0 : index
    %3 = vector.load %arg3[%c0_3, %c0_4] : memref<1x32xf32, #tpu.memory_space<vmem>>, vector<1x32xf32>
    %4 = vector.broadcast %3 : vector<1x32xf32> to vector<8x32xf32>
    %5 = arith.addf %2, %4 : vector<8x32xf32>
    %cst_5 = arith.constant 0.000000e+00 : f32
    %6 = vector.broadcast %cst_5 : f32 to vector<8x32xf32>
    %7 = arith.maximumf %5, %6 : vector<8x32xf32>
    %c0_6 = arith.constant 0 : index
    %c0_7 = arith.constant 0 : index
    %8 = vector.load %arg4[%c0_6, %c0_7] : memref<32x32xf32, #tpu.memory_space<vmem>>, vector<32x32xf32>
    %cst_8 = arith.constant dense<0.000000e+00> : vector<8x32xf32>
    %9 = tpu.matmul %7, %8, %cst_8 {dimension_numbers = #tpu.dot_dimension_numbers<[1], [0], [0], [1], [0, 0, 1, 1], [], []>} : vector<8x32xf32>, vector<32x32xf32>, vector<8x32xf32> -> vector<8x32xf32>
    %c0_9 = arith.constant 0 : index
    %c0_10 = arith.constant 0 : index
    %10 = vector.load %arg5[%c0_9, %c0_10] : memref<1x32xf32, #tpu.memory_space<vmem>>, vector<1x32xf32>
    %11 = vector.broadcast %10 : vector<1x32xf32> to vector<8x32xf32>
    %12 = arith.addf %9, %11 : vector<8x32xf32>
    %cst_11 = arith.constant 0.000000e+00 : f32
    %13 = vector.broadcast %cst_11 : f32 to vector<8x32xf32>
    %14 = arith.maximumf %12, %13 : vector<8x32xf32>
    %c0_12 = arith.constant 0 : index
    %c0_13 = arith.constant 0 : index
    %15 = vector.load %arg6[%c0_12, %c0_13] : memref<32x64xf32, #tpu.memory_space<vmem>>, vector<32x64xf32>
    %cst_14 = arith.constant dense<0.000000e+00> : vector<8x64xf32>
    %16 = tpu.matmul %14, %15, %cst_14 {dimension_numbers = #tpu.dot_dimension_numbers<[1], [0], [0], [1], [0, 0, 1, 1], [], []>} : vector<8x32xf32>, vector<32x64xf32>, vector<8x64xf32> -> vector<8x64xf32>
    %c0_15 = arith.constant 0 : index
    %c0_16 = arith.constant 0 : index
    %17 = vector.load %arg7[%c0_15, %c0_16] : memref<1x64xf32, #tpu.memory_space<vmem>>, vector<1x64xf32>
    %18 = vector.broadcast %17 : vector<1x64xf32> to vector<8x64xf32>
    %19 = arith.addf %16, %18 : vector<8x64xf32>
    %c0_17 = arith.constant 0 : index
    %c0_18 = arith.constant 0 : index
    %20 = vector.load %arg8[%c0_17, %c0_18] : memref<8x64xf32, #tpu.memory_space<vmem>>, vector<8x64xf32>
    tpu.vector_store %arg8[%c0_17, %c0_18], %19 {strides = array<i32>} : memref<8x64xf32, #tpu.memory_space<vmem>>, vector<8x64xf32>,
    return
  }
  func.func @transform_0(%arg0: i32) -> (i32, i32) {
    %c0_i32 = arith.constant 0 : i32
    %c0_i32_0 = arith.constant 0 : i32
    return %arg0, %c0_i32 : i32, i32
  }
  func.func @transform_1(%arg0: i32) -> (i32, i32) {
    %c0_i32 = arith.constant 0 : i32
    %c0_i32_0 = arith.constant 0 : i32
    %c0_i32_1 = arith.constant 0 : i32
    return %c0_i32, %c0_i32_0 : i32, i32
  }
  func.func @transform_2(%arg0: i32) -> (i32, i32) {
    %c0_i32 = arith.constant 0 : i32
    %c0_i32_0 = arith.constant 0 : i32
    %c0_i32_1 = arith.constant 0 : i32
    return %c0_i32, %c0_i32_0 : i32, i32
  }
  func.func @transform_3(%arg0: i32) -> (i32, i32) {
    %c0_i32 = arith.constant 0 : i32
    %c0_i32_0 = arith.constant 0 : i32
    %c0_i32_1 = arith.constant 0 : i32
    return %c0_i32, %c0_i32_0 : i32, i32
  }
  func.func @transform_4(%arg0: i32) -> (i32, i32) {
    %c0_i32 = arith.constant 0 : i32
    %c0_i32_0 = arith.constant 0 : i32
    %c0_i32_1 = arith.constant 0 : i32
    return %c0_i32, %c0_i32_0 : i32, i32
  }
  func.func @transform_5(%arg0: i32) -> (i32, i32) {
    %c0_i32 = arith.constant 0 : i32
    %c0_i32_0 = arith.constant 0 : i32
    %c0_i32_1 = arith.constant 0 : i32
    return %c0_i32, %c0_i32_0 : i32, i32
  }
  func.func @transform_6(%arg0: i32) -> (i32, i32) {
    %c0_i32 = arith.constant 0 : i32
    %c0_i32_0 = arith.constant 0 : i32
    %c0_i32_1 = arith.constant 0 : i32
    return %c0_i32, %c0_i32_0 : i32, i32
  }
  func.func @transform_7(%arg0: i32) -> (i32, i32) {
    %c0_i32 = arith.constant 0 : i32
    %c0_i32_0 = arith.constant 0 : i32
    return %arg0, %c0_i32 : i32, i32
  }
}

</mosaic_0001>

<bundles_post_ra>
// kernel: decoder_forward.1
= control target key start
LH: loop header
LB: loop body
LE: loop exit
PB: predicated region body
PF: predicated region fallthrough
CT: control target
= control target key end

     0   :  { %12 = vsyncpa [#allocation3], 0  ;;  %s676_s0 = inlined_call_operand.hbm [shape: f32[8,16], index: 0, kind: input, shape index: {}]   ;;  %s677_s1 = inlined_call_operand.hbm [shape: f32[16,32], index: 1, kind: input, shape index: {}]   ;;  %s678_s2 = inlined_call_operand.vmem [shape: f32[1,32], index: 2, kind: input, shape index: {}]   ;;  %s679_s3 = inlined_call_operand.hbm [shape: f32[32,32], index: 3, kind: input, shape index: {}]   ;;  %s680_s4 = inlined_call_operand.vmem [shape: f32[1,32], index: 4, kind: input, shape index: {}]   ;;  %s681_s5 = inlined_call_operand.hbm [shape: f32[32,64], index: 5, kind: input, shape index: {}]   ;;  %s682_s6 = inlined_call_operand.vmem [shape: f32[1,64], index: 6, kind: input, shape index: {}]   ;;  %s683_s7 = inlined_call_operand.hbm [shape: f32[8,64], index: 7, kind: output, shape index: {}]  }
   0x1   :  { %13 = vsyncpa [#allocation6], 0 }
   0x2   :  { %14 = vsyncpa [#allocation9], 0 }
   0x3   :  { %15 = vsyncpa [#allocation4], 0  ;;  %s545_s24 = smov [#allocation5]   ;;  %s427_s28 = scalar_lea.hbm %s677_s1, 256 }
   0x4   :  { %s31_s25 = sshll.u32 %s545_s24, 4  ;;  %p428_p0 = scmp.ne.s32.totalorder %s677_s1, %s427_s28  ;;  %s32_s25 = int_to_ptr.vmem [resolvable:$true] %s31_s25 }
   0x5   :  { %p431_p1 = scmp.lt.u32.totalorder %s427_s28, %s677_s1 }
   0x7   :  { %p433_p2 = pnand %p431_p1, %p428_p0 }
   0x9   :  { %436 = shalt.err (!%p433_p2)
}
   0xa   :  { %s437_s10 = scalar_lea.vmem %s32_s25, 256  ;;  %p442_p4 = scmp.lt.s32.totalorder %s32_s25, %s32_s25 }
   0xb   :  { %p438_p3 = scmp.ne.s32.totalorder %s32_s25, %s437_s10  ;;  %p443_p5 = scmp.lt.s32.totalorder %s437_s10, %s437_s10 }
   0xd   :  { %p444_p6 = por %p443_p5, %p442_p4 }
   0xf   :  { %p445_p7 = pnand %p444_p6, %p438_p3 }
  0x11   :  { %448 = shalt.err (!%p445_p7)
}
  0x12   :  { %s546_s11 = smov 128   ;;  %s547_s12 = smov 8  }
  0x13   :  { %37 = dma.hbm_to_vmem [thread:$0]  %s677_s1, 256, %s32_s25, [#allocation6], %s546_s11, %s546_s11, %s547_s12  }
  0x14   :  { %s548_s15 = smov [#allocation2]   ;;  %s549_s17 = smov [#allocation7]  }
  0x15   :  { %s22_s16 = sshll.u32 %s548_s15, 4  ;;  %s45_s18 = sshll.u32 %s549_s17, 4  ;;  %s23_s16 = int_to_ptr.vmem [resolvable:$true] %s22_s16  ;;  %s46_s18 = int_to_ptr.vmem [resolvable:$true] %s45_s18 }
  0x16   :  { %s449_s21 = scalar_lea.hbm %s676_s0, 128 }
  0x17   :  { %p450_p8 = scmp.ne.s32.totalorder %s676_s0, %s449_s21  ;;  %p453_p9 = scmp.lt.u32.totalorder %s449_s21, %s676_s0 }
  0x19   :  { %p455_p10 = pnand %p453_p9, %p450_p8 }
  0x1b   :  { %458 = shalt.err (!%p455_p10)
}
  0x1c   :  { %s459_s1 = scalar_lea.vmem %s23_s16, 128  ;;  %p464_p12 = scmp.lt.s32.totalorder %s23_s16, %s23_s16 }
  0x1d   :  { %p460_p11 = scmp.ne.s32.totalorder %s23_s16, %s459_s1  ;;  %p465_p13 = scmp.lt.s32.totalorder %s459_s1, %s459_s1 }
  0x1f   :  { %p466_p0 = por %p465_p13, %p464_p12 }
  0x21   :  { %p467_p1 = pnand %p466_p0, %p460_p11 }
  0x23   :  { %470 = shalt.err (!%p467_p1)
}
  0x24   :  { %25 = dma.hbm_to_vmem [thread:$0]  %s676_s0, 128, %s23_s16, [#allocation3]  }
  0x25   :  { %s471_s30 = scalar_lea.hbm %s679_s3, 512 }
  0x26   :  { %p472_p2 = scmp.ne.s32.totalorder %s679_s3, %s471_s30  ;;  %p475_p3 = scmp.lt.u32.totalorder %s471_s30, %s679_s3 }
  0x28   :  { %p477_p4 = pnand %p475_p3, %p472_p2 }
  0x2a   :  { %480 = shalt.err (!%p477_p4)
}
  0x2b   :  { %s481_s14 = scalar_lea.vmem %s46_s18, 512  ;;  %p486_p6 = scmp.lt.s32.totalorder %s46_s18, %s46_s18 }
  0x2c   :  { %p482_p5 = scmp.ne.s32.totalorder %s46_s18, %s481_s14  ;;  %p487_p7 = scmp.lt.s32.totalorder %s481_s14, %s481_s14 }
  0x2e   :  { %p488_p8 = por %p487_p7, %p486_p6 }
  0x30   :  { %p489_p9 = pnand %p488_p8, %p482_p5 }
  0x32   :  { %492 = shalt.err (!%p489_p9)
}
  0x33   :  { %51 = dma.hbm_to_vmem [thread:$0]  %s679_s3, 512, %s46_s18, [#allocation6], %s546_s11, %s546_s11, %s547_s12  }
  0x34   :  { %s550_s16 = smov [#allocation8]   ;;  %s493_s21 = scalar_lea.hbm %s681_s5, 512 }
  0x35   :  { %s59_s17 = sshll.u32 %s550_s16, 4  ;;  %p494_p10 = scmp.ne.s32.totalorder %s681_s5, %s493_s21  ;;  %s60_s17 = int_to_ptr.vmem [resolvable:$true] %s59_s17 }
  0x36   :  { %p497_p11 = scmp.lt.u32.totalorder %s493_s21, %s681_s5 }
  0x38   :  { %p499_p12 = pnand %p497_p11, %p494_p10 }
  0x3a   :  { %502 = shalt.err (!%p499_p12)
}
  0x3b   :  { %s503_s1 = scalar_lea.vmem %s60_s17, 512  ;;  %p508_p0 = scmp.lt.s32.totalorder %s60_s17, %s60_s17 }
  0x3c   :  { %p504_p13 = scmp.ne.s32.totalorder %s60_s17, %s503_s1  ;;  %p509_p1 = scmp.lt.s32.totalorder %s503_s1, %s503_s1 }
  0x3e   :  { %p510_p2 = por %p509_p1, %p508_p0 }
  0x40   :  { %p511_p3 = pnand %p510_p2, %p504_p13 }
  0x42   :  { %514 = shalt.err (!%p511_p3)
}
  0x43   :  { %65 = dma.hbm_to_vmem [thread:$0]  %s681_s5, 512, %s60_s17, [#allocation9], %s546_s11, %s546_s11, %s547_s12  }
  0x44   :  { %537 = dma.done.wait [#allocation3], 128  }
  0x45   :  { %538 = vsyncadd [#allocation3], 4294967168 }
  0x46   :  { %539 = dma.done.wait [#allocation6], 768  }
  0x47   :  { %540 = vsyncadd [#allocation6], 4294966528 }
  0x48   :  { %541 = dma.done.wait [#allocation9], 512  }
  0x49   :  { %542 = vsyncadd [#allocation9], 4294966784  ;;  %v551_v0 = vmov 0.0|0.0   ;;  %vm552_vm0 = vmmov 0   ;;  %v553_v1 = vmov 0.0   ;;  %v81_v2 = vld [vmem:[#allocation5] sm:$0xff] }
  0x4a   :  { %402 = vmatprep.subr.bf16.mxu0 %v551_v0  ;;  %377 = vmatprep.mubr.msk.f32.mxu0 %vm552_vm0, %v553_v1  ;;  %v82_v3 = vld [vmem:[#allocation5 + $0x8] sm:$0xff]  ;;  %v165_v5 = vld [vmem:[#allocation7] sm:$0xff]  ;;  %v166_v6 = vld [vmem:[#allocation7 + $0x8] sm:$0xff]  ;;  %vm90_vm1 = vcmask 130048   ;;  %vm176_vm2 = vcmask 261120   ;;  %s554_s28 = smov [#allocation10]  }
  0x4b   :  { %405 = vmatprep.subr.bf16.mxu1 %v551_v0  ;;  %388 = vmatprep.mubr.msk.f32.mxu1 %vm552_vm0, %v553_v1  ;;  %v403_v4 = vpack.c.bf16 %v82_v3, %v81_v2  ;;  %v406_v7 = vpack.c.bf16 %v166_v6, %v165_v5  ;;  %v80_v8 = vld [vmem:[#allocation2] sm:$0xff]  ;;  %v167_v9 = vld [vmem:[#allocation7 + $0x10] sm:$0xff]  ;;  %v168_v10 = vld [vmem:[#allocation7 + $0x18] sm:$0xff]  ;;  %s343_s29 = sshll.u32 %s554_s28, 4  ;;  %vm335_vm3 = vcmask 523264   ;;  %s344_s29 = int_to_ptr.vmem [resolvable:$true] %s343_s29 }
  0x4c   :  { %v409_v11 = vpack.c.bf16 %v168_v10, %v167_v9  ;;  %v251_v12 = vld [vmem:[#allocation8] sm:$0xff]  ;;  %v252_v13 = vld [vmem:[#allocation8 + $0x8] sm:$0xff]  ;;  %v253_v20 = vld [vmem:[#allocation8 + $0x10] sm:$0xff]  ;;  %s515_s30 = scalar_lea.vmem %s344_s29, 128  ;;  %p520_p5 = scmp.lt.s32.totalorder %s344_s29, %s344_s29 }
  0x4d   :  { %404 = vmatpush3.bf16.msra.mxu0 %v403_v4  ;;  %407 = vmatpush3.bf16.msra.mxu1 %v406_v7  ;;  %v412_v14 = vpack.c.bf16 %v252_v13, %v251_v12  ;;  %v354_v15 = vld [vmem:[%s678_s2] ss:$0 sm:$0xff]  ;;  %v254_v21 = vld [vmem:[#allocation8 + $0x18] sm:$0xff]  ;;  %p516_p4 = scmp.ne.s32.totalorder %s344_s29, %s515_s30  ;;  %p521_p6 = scmp.lt.s32.totalorder %s515_s30, %s515_s30 }
  0x4e   :  { %411 = vmatprep.subr.bf16.mxu0 %v551_v0  ;;  %408 = vmatprep.subr.bf16.mxu1 %v551_v0  ;;  %v415_v22 = vpack.c.bf16 %v254_v21, %v253_v20  ;;  %v356_v23 = vld [vmem:[%s680_s4] ss:$0 sm:$0xff] }
  0x4f   :  { %v358_v28 = vld [vmem:[%s682_s6] ss:$0 sm:$0xff]  ;;  %p522_p7 = por %p521_p6, %p520_p5 }
  0x50   :  { %378 = vmatmul.mubr.msk.f32.vlgmr.msra.gmra.mrb[0].mxu0 %vm90_vm1, %v80_v8 }
  0x51   :  { %399 = vmatprep.mubr.msk.f32.mxu0 %vm552_vm0, %v553_v1  ;;  %410 = vmatpush3.bf16.msra.mxu1 %v409_v11  ;;  %p523_p8 = pnand %p522_p7, %p516_p4 }
  0x52   :  { %413 = vmatpush3.bf16.msra.mxu0 %v412_v14 }
  0x53   :  { %414 = vmatprep.subr.bf16.mxu0 %v551_v0 }
  0x56   :  { %416 = vmatpush3.bf16.msra.mxu0 %v415_v22 }
 0x123   :  { %v160_v16 = vpop.f32.mrb[0].mxu0 }
 0x124   :  { %v161_v17 = vadd.f32 %v354_v15, %v160_v16  ;;  %v379_v18 = vpop.f32.mrb[1].mxu0 }
 0x126   :  { %v164_v19 = vmax.f32 %v161_v17, 0.0 }
 0x128   :  { %389 = vmatmul.mubr.msk.f32.vlgmr.msra.gmra.mrb[0].mxu1 %vm176_vm2, %v164_v19 }
 0x1fb   :  { %v246_v24 = vpop.f32.mrb[0].mxu1 }
 0x1fc   :  { %v247_v25 = vadd.f32 %v356_v23, %v246_v24  ;;  %v390_v26 = vpop.f32.mrb[1].mxu1 }
 0x1fe   :  { %v250_v27 = vmax.f32 %v247_v25, 0.0 }
 0x200   :  { %400 = vmatmul.mubr.msk.f32.vlgmr.msra.gmra.mrb[2].mxu0 %vm176_vm2, %v250_v27 }
 0x2d3   :  { %v331_v29 = vpop.f32.mrb[2].mxu0 }
 0x2d4   :  { %v332_v30 = vadd.f32 %v358_v28, %v331_v29  ;;  %v401_v31 = vpop.f32.mrb[3].mxu0 }
 0x2d6   :  { %336 = vst.msk [vmem:[#allocation10] sm:$0xff] %vm335_vm3, %v332_v30 }
 0x2d7   :  { %526 = shalt.err (!%p523_p8)
}
 0x2d8   :  { %s527_s9 = scalar_lea.hbm %s683_s7, 128 }
 0x2d9   :  { %p528_p9 = scmp.ne.s32.totalorder %s683_s7, %s527_s9  ;;  %p531_p10 = scmp.lt.u32.totalorder %s527_s9, %s683_s7 }
 0x2db   :  { %p533_p11 = pnand %p531_p10, %p528_p9 }
 0x2dd   :  { %536 = shalt.err (!%p533_p11)
}
 0x2de   :  { %346 = dma.vmem_to_hbm [thread:$0]  %s344_s29, 128, %s683_s7, [#allocation4]  }
 0x2df   :  { %543 = dma.done.wait [#allocation4], 128  }
 0x2e0   :  { %544 = vsyncadd [#allocation4], 4294967168 }
 0x2e1   :  { %350 = vsyncpa [#allocation3], 1 }
 0x2e2   :  { %351 = vsyncpa [#allocation6], 1 }
 0x2e3   :  { %352 = vsyncpa [#allocation9], 1 }
 0x2e4   :  { %353 = vsyncpa [#allocation4], 1 }

</bundles_post_ra>
